<compile_context>
chip_gen: v5e
topology: v5e:2x2
jax: 0.10.0
libtpu: 0.0.40
codegen_flags: <defaults>
</compile_context>

<pallas_src>
import functools

import jax
import jax.numpy as jnp
from jax.experimental import pallas as pl
from jax.experimental.pallas import tpu as pltpu


def attention_kernel(enc_ref, dec_ref, we_t_ref, wd_t_ref, b1_ref, wv_ref,
                     o_ref, *, approx_recip=True):
    # enc_ref:  [S, Bt, H]  encoder outputs, native seq-major layout
    # dec_ref:  [Bt, E]     decoder input (one step per batch element)
    # we_t_ref: [H, H]      encoder half of Linear(H+E->H).weight, pre-transposed
    # wd_t_ref: [E, H]      decoder half of Linear(H+E->H).weight, pre-transposed
    # b1_ref:   [1, H]      Linear(H+E->H).bias
    # wv_ref:   [1, H]      v.weight  (v.bias dropped: softmax shift-invariance)
    # o_ref:    [Bt, S]     softmax over S (lane axis)
    S, Bt, H = enc_ref.shape
    mm_dtype = we_t_ref.dtype
    sub = 16 if jnp.dtype(enc_ref.dtype).itemsize == 2 else 8

    if Bt % sub == 0:
        # Fast path: one 2-D MXU matmul over all S*Bt rows.  The (S, Bt)
        # collapse is a pure leading-dim reshape because Bt is sublane-aligned
        # (the wrapper guarantees this whenever B allows).
        enc_2d = enc_ref[...].reshape(S * Bt, H).astype(mm_dtype)
        h_enc = jnp.dot(enc_2d, we_t_ref[...],
                        preferred_element_type=jnp.float32).reshape(S, Bt, H)
    else:
        # Tiny / unaligned batch fallback (e.g. B = 2): standard batched
        # matmul over the S axis (same structure as a flash-attn PV matmul).
        we3 = jnp.broadcast_to(we_t_ref[...], (S, H, H))
        h_enc = jnp.einsum('sbh,shk->sbk',
                           enc_ref[...].astype(mm_dtype), we3,
                           preferred_element_type=jnp.float32)      # [S, Bt, H]

    # Decoder projection computed ONCE per batch element (not repeated over S).
    h_dec = jnp.dot(dec_ref[...].astype(mm_dtype), wd_t_ref[...],
                    preferred_element_type=jnp.float32)             # [Bt, H]

    # tanh in f32 on the VPU/EUP; h_dec and b1 broadcast over the S rows.
    h = jnp.tanh(h_enc
                 + h_dec[None, :, :]
                 + b1_ref[...][None, :, :])                         # [S, Bt, H]

    # v-projection as a VPU multiply + lane reduction over H (keeps the MXU
    # free for the only matmul that matters; no [*, 1] intermediates).
    scores_sb = jnp.sum(h * wv_ref[...][None, :, :], axis=-1)       # [S, Bt]

    # Tiny XLU relayout so the softmax over S is a lane reduction and the
    # output store is lane-dense over S.
    scores = scores_sb.T                                            # [Bt, S]
    m = jnp.max(scores, axis=-1, keepdims=True)
    e = jnp.exp(scores - m)
    denom = jnp.sum(e, axis=-1, keepdims=True)
    if approx_recip:
        o_ref[...] = e * pl.reciprocal(denom, approx=True)
    else:
        o_ref[...] = e / denom


def _vmem_capacity_bytes():
    try:
        return int(pltpu.get_tpu_info().vmem_capacity_bytes)
    except Exception:
        return 64 * 1024 * 1024          # conservative v7x floor


def _pick_block_b(B, S, H, enc_dtype, requested, vmem_cap):
    """Pick a batch-block size: a divisor of B, sublane-aligned when < B."""
    itemsize = jnp.dtype(enc_dtype).itemsize
    align = 16 if itemsize == 2 else 8   # bf16 packs 16 rows per sublane group

    def largest_valid(upper):
        upper = min(int(upper), B)
        for cand in range(upper, 0, -1):
            if B % cand == 0 and cand % align == 0:
                return cand
        return None

    if requested is not None:
        if requested >= B:
            return B
        got = largest_valid(requested)
        return got if got is not None else B

    # Generation-aware target: ~VMEM/8 per enc block (double-buffered input
    # plus the f32 h_enc / h intermediates are ~4x the block in VMEM).
    target_bytes = vmem_cap // 8         # ~8 MiB on v7x, ~16 MiB on v5e/v6e
    row_bytes = max(S * H * itemsize, 1)
    target_bb = max(align, target_bytes // row_bytes)
    if B >= 2 * align:
        target_bb = min(target_bb, B // 2)   # >= 2 pipelined / megacore steps
    got = largest_valid(target_bb)
    return got if got is not None else B


def attention_forward(dec_input, enc_output, w1, b1, wv, bv=None, *,
                      block_b=None, matmul_dtype=None, approx_recip=True):
    """Forward pass of the Attention module.

    dec_input:  [1, B, E] or [B, E]
    enc_output: [S, B, H]
    w1: [H, H+E]  (nn.Linear(H+E, H).weight, PyTorch [out, in] layout)
    b1: [H]       (nn.Linear(H+E, H).bias)
    wv: [1, H]    (v.weight)
    bv: [1]       (v.bias) -- accepted for API parity but unused: the softmax
                  is shift-invariant, so the scalar bias cancels exactly.
    matmul_dtype: e.g. jnp.bfloat16 to run MXU operands in bf16 (all TPU
                  generations); operands are cast INSIDE the kernel (no extra
                  HBM round trip); accumulation / tanh / softmax stay f32.
    Returns softmax attention of shape [S, B, 1] (softmax over dim 0).
    """
    del bv  # mathematically a no-op under softmax
    S, B, H = enc_output.shape
    dec2d = dec_input.reshape(-1, dec_input.shape[-1])   # [1,B,E] or [B,E]
    if dec2d.shape[0] != B:
        raise ValueError("dec_input batch does not match enc_output batch")
    E = dec2d.shape[-1]
    if w1.shape != (H, H + E):
        raise ValueError("w1 must have shape [H, H+E]")

    # Split + pre-transpose the fused Linear(H+E->H) weight (tiny, folded by
    # XLA):  cat([enc, dec], -1) @ W1.T == enc @ We.T + dec @ Wd.T.
    we_t = jnp.transpose(w1[:, :H])                        # [H, H]
    wd_t = jnp.transpose(w1[:, H:])                        # [E, H]
    b1_2d = b1.reshape(1, H).astype(jnp.float32)
    wv_2d = wv.reshape(1, H).astype(jnp.float32)
    if matmul_dtype is not None:
        we_t = we_t.astype(matmul_dtype)
        wd_t = wd_t.astype(matmul_dtype)

    vmem_cap = _vmem_capacity_bytes()
    block_b = _pick_block_b(B, S, H, enc_output.dtype, block_b, vmem_cap)
    grid = (B // block_b,)
    vmem_limit = int(min(vmem_cap * 3 // 4, 128 * 1024 * 1024))

    kernel = functools.partial(attention_kernel, approx_recip=approx_recip)

    out_bs = pl.pallas_call(
        kernel,
        out_shape=jax.ShapeDtypeStruct((B, S), jnp.float32),
        grid_spec=pltpu.PrefetchScalarGridSpec(
            num_scalar_prefetch=0,
            grid=grid,
            in_specs=[
                # enc streamed in its native [S, B, H] layout, blocked over B.
                pl.BlockSpec((S, block_b, H), lambda b: (0, b, 0)),
                pl.BlockSpec((block_b, E), lambda b: (b, 0)),
                # Invariant weights / bias: constant index_maps.
                pl.BlockSpec((H, H), lambda b: (0, 0)),
                pl.BlockSpec((E, H), lambda b: (0, 0)),
                pl.BlockSpec((1, H), lambda b: (0, 0)),
                pl.BlockSpec((1, H), lambda b: (0, 0)),
            ],
            out_specs=pl.BlockSpec((block_b, S), lambda b: (b, 0)),
        ),
        compiler_params=pltpu.CompilerParams(
            dimension_semantics=("parallel",),
            vmem_limit_bytes=vmem_limit,
        ),
    )(enc_output, dec2d, we_t, wd_t, b1_2d, wv_2d)

    # Back to PyTorch's [S, B, 1] convention (tiny output, cheap relayout).
    return jnp.transpose(out_bs, (1, 0))[:, :, None]


def reference_forward(dec_input, enc_output, w1, b1, wv, bv):
    """Pure-JAX mirror of the PyTorch module (repeat + concat + linears)."""
    S, B, H = enc_output.shape
    dec2d = dec_input.reshape(-1, dec_input.shape[-1])
    s_rep = jnp.broadcast_to(dec2d[None], (S, B, dec2d.shape[-1]))
    x = jnp.concatenate([enc_output, s_rep], axis=2)          # [S, B, H+E]
    h = jnp.tanh(x @ w1.T + b1)                               # [S, B, H]
    att = h @ wv.T + bv                                       # [S, B, 1]
    return jax.nn.softmax(att, axis=0)


if __name__ == "__main__":
    seq_len, batch, embed_dim, hidden = 8, 2, 32, 32

    key = jax.random.PRNGKey(0)
    k1, k2, k3, k4, k5, k6 = jax.random.split(key, 6)

    # Deterministic synthetic parameters in PyTorch nn.Linear layout ([out, in]).
    w1 = jax.random.normal(k1, (hidden, hidden + embed_dim), jnp.float32) * 0.1
    b1 = jax.random.normal(k2, (hidden,), jnp.float32) * 0.1
    wv = jax.random.normal(k3, (1, hidden), jnp.float32) * 0.1
    bv = jax.random.normal(k4, (1,), jnp.float32) * 0.1

    # Inputs: dec_input [1, B, E], enc_output [S, B, H].
    dec_input = jax.random.normal(k5, (1, batch, embed_dim), jnp.float32)
    enc_output = jax.random.normal(k6, (seq_len, batch, hidden), jnp.float32)

    ref = reference_forward(dec_input, enc_output, w1, b1, wv, bv)

    # Exact epilogue (true divide): matches nn.Linear semantics tightly.
    out_exact = attention_forward(dec_input, enc_output, w1, b1, wv, bv,
                                  approx_recip=False)
    out_exact = jax.block_until_ready(out_exact)
    assert out_exact.shape == (seq_len, batch, 1)
    assert jnp.allclose(out_exact, ref, atol=1e-5, rtol=1e-5)

    # Default path: EUP approximate reciprocal in the softmax epilogue.
    out = attention_forward(dec_input, enc_output, w1, b1, wv, bv)
    out = jax.block_until_ready(out)
    assert out.shape == (seq_len, batch, 1)
    assert jnp.allclose(out, ref, atol=1e-2, rtol=0)

    # bf16 MXU-operand variant (cast inside the kernel; f32 accumulate/softmax).
    out_bf16 = attention_forward(dec_input, enc_output, w1, b1, wv, bv,
                                 matmul_dtype=jnp.bfloat16)
    out_bf16 = jax.block_until_ready(out_bf16)
    assert jnp.allclose(out_bf16, ref, atol=5e-2, rtol=0)

    # Larger batch: exercises the sublane-aligned fast path and a multi-step
    # "parallel" grid (block_b = 8 -> 2 pipelined batch blocks).
    batch2 = 16
    kk = jax.random.split(jax.random.PRNGKey(1), 2)
    dec2 = jax.random.normal(kk[0], (1, batch2, embed_dim), jnp.float32)
    enc2 = jax.random.normal(kk[1], (seq_len, batch2, hidden), jnp.float32)
    ref2 = reference_forward(dec2, enc2, w1, b1, wv, bv)
    out2 = attention_forward(dec2, enc2, w1, b1, wv, bv, approx_recip=False)
    out2 = jax.block_until_ready(out2)
    assert out2.shape == (seq_len, batch2, 1)
    assert jnp.allclose(out2, ref2, atol=1e-5, rtol=1e-5)

    print("KERNEL_OK")
</pallas_src>

<mosaic_0001>
module attributes {stable_mosaic.version = 11 : i64} {
  func.func @attention_kernel(%arg0: i32, %arg1: memref<8x2x32xf32, #tpu.memory_space<vmem>>, %arg2: memref<2x32xf32, #tpu.memory_space<vmem>>, %arg3: memref<32x32xf32, #tpu.memory_space<vmem>>, %arg4: memref<32x32xf32, #tpu.memory_space<vmem>>, %arg5: memref<1x32xf32, #tpu.memory_space<vmem>>, %arg6: memref<1x32xf32, #tpu.memory_space<vmem>>, %arg7: memref<2x8xf32, #tpu.memory_space<vmem>>) attributes {dimension_semantics = [#tpu.dimension_semantics<parallel>], iteration_bounds = array<i64: 1>, scalar_prefetch = 0 : i64, scratch_operands = 0 : i64, tpu.core_type = #tpu.core_type<tc>, window_params = [{transform_indices = @transform_0, window_bounds = array<i64: 8, 2, 32>}, {transform_indices = @transform_1, window_bounds = array<i64: 2, 32>}, {pipeline_mode = #tpu.pipeline_mode<synchronous>, transform_indices = @transform_2, window_bounds = array<i64: 32, 32>}, {pipeline_mode = #tpu.pipeline_mode<synchronous>, transform_indices = @transform_3, window_bounds = array<i64: 32, 32>}, {pipeline_mode = #tpu.pipeline_mode<synchronous>, transform_indices = @transform_4, window_bounds = array<i64: 1, 32>}, {pipeline_mode = #tpu.pipeline_mode<synchronous>, transform_indices = @transform_5, window_bounds = array<i64: 1, 32>}, {transform_indices = @transform_6, window_bounds = array<i64: 2, 8>}]} {
    %c0 = arith.constant 0 : index
    %c0_0 = arith.constant 0 : index
    %0 = vector.load %arg3[%c0, %c0_0] : memref<32x32xf32, #tpu.memory_space<vmem>>, vector<32x32xf32>
    %1 = vector.shape_cast %0 : vector<32x32xf32> to vector<1x32x32xf32>
    %2 = vector.broadcast %1 : vector<1x32x32xf32> to vector<8x32x32xf32>
    %c0_1 = arith.constant 0 : index
    %c0_2 = arith.constant 0 : index
    %c0_3 = arith.constant 0 : index
    %3 = vector.load %arg1[%c0_1, %c0_2, %c0_3] : memref<8x2x32xf32, #tpu.memory_space<vmem>>, vector<8x2x32xf32>
    "tpu.trace_start"() <{level = 10 : i32, message = "sbh,shk->sbk"}> : () -> ()
    %cst = arith.constant dense<0.000000e+00> : vector<8x2x32xf32>
    %4 = tpu.matmul %3, %2, %cst {dimension_numbers = #tpu.dot_dimension_numbers<[2], [1], [1], [2], [0, 0, 0, 1, 1, 2], [0], [0]>} : vector<8x2x32xf32>, vector<8x32x32xf32>, vector<8x2x32xf32> -> vector<8x2x32xf32>
    "tpu.trace_stop"() : () -> ()
    %c0_4 = arith.constant 0 : index
    %c0_5 = arith.constant 0 : index
    %5 = vector.load %arg2[%c0_4, %c0_5] : memref<2x32xf32, #tpu.memory_space<vmem>>, vector<2x32xf32>
    %c0_6 = arith.constant 0 : index
    %c0_7 = arith.constant 0 : index
    %6 = vector.load %arg4[%c0_6, %c0_7] : memref<32x32xf32, #tpu.memory_space<vmem>>, vector<32x32xf32>
    %cst_8 = arith.constant dense<0.000000e+00> : vector<2x32xf32>
    %7 = tpu.matmul %5, %6, %cst_8 {dimension_numbers = #tpu.dot_dimension_numbers<[1], [0], [0], [1], [0, 0, 1, 1], [], []>} : vector<2x32xf32>, vector<32x32xf32>, vector<2x32xf32> -> vector<2x32xf32>
    %8 = vector.shape_cast %7 : vector<2x32xf32> to vector<1x2x32xf32>
    %9 = vector.broadcast %8 : vector<1x2x32xf32> to vector<8x2x32xf32>
    %10 = arith.addf %4, %9 : vector<8x2x32xf32>
    %c0_9 = arith.constant 0 : index
    %c0_10 = arith.constant 0 : index
    %11 = vector.load %arg5[%c0_9, %c0_10] : memref<1x32xf32, #tpu.memory_space<vmem>>, vector<1x32xf32>
    %12 = vector.shape_cast %11 : vector<1x32xf32> to vector<1x1x32xf32>
    %13 = vector.broadcast %12 : vector<1x1x32xf32> to vector<8x2x32xf32>
    %14 = arith.addf %10, %13 : vector<8x2x32xf32>
    %15 = math.tanh %14 : vector<8x2x32xf32>
    %c0_11 = arith.constant 0 : index
    %c0_12 = arith.constant 0 : index
    %16 = vector.load %arg6[%c0_11, %c0_12] : memref<1x32xf32, #tpu.memory_space<vmem>>, vector<1x32xf32>
    %17 = vector.shape_cast %16 : vector<1x32xf32> to vector<1x1x32xf32>
    %18 = vector.broadcast %17 : vector<1x1x32xf32> to vector<8x2x32xf32>
    %19 = arith.mulf %15, %18 : vector<8x2x32xf32>
    %cst_13 = arith.constant dense<0.000000e+00> : vector<8x2xf32>
    %20 = vector.multi_reduction <add>, %19, %cst_13 [2] : vector<8x2x32xf32> to vector<8x2xf32>
    %21 = tpu.transpose %20, [1, 0] : vector<8x2xf32> -> vector<2x8xf32>
    %cst_14 = arith.constant dense<0xFF800000> : vector<2xf32>
    %22 = vector.multi_reduction <maximumf>, %21, %cst_14 [1] : vector<2x8xf32> to vector<2xf32>
    %23 = vector.shape_cast %22 : vector<2xf32> to vector<2x1xf32>
    %24 = vector.broadcast %23 : vector<2x1xf32> to vector<2x8xf32>
    %25 = arith.subf %21, %24 : vector<2x8xf32>
    %26 = math.exp %25 : vector<2x8xf32>
    %cst_15 = arith.constant dense<0.000000e+00> : vector<2xf32>
    %27 = vector.multi_reduction <add>, %26, %cst_15 [1] : vector<2x8xf32> to vector<2xf32>
    %28 = vector.shape_cast %27 : vector<2xf32> to vector<2x1xf32>
    %29 = vector.broadcast %28 : vector<2x1xf32> to vector<2x8xf32>
    %30 = arith.divf %26, %29 : vector<2x8xf32>
    %c0_16 = arith.constant 0 : index
    %c0_17 = arith.constant 0 : index
    %31 = vector.load %arg7[%c0_16, %c0_17] : memref<2x8xf32, #tpu.memory_space<vmem>>, vector<2x8xf32>
    tpu.vector_store %arg7[%c0_16, %c0_17], %30 {strides = array<i32>} : memref<2x8xf32, #tpu.memory_space<vmem>>, vector<2x8xf32>,
    return
  }
  func.func @transform_0(%arg0: i32) -> (i32, i32, i32) {
    %c0_i32 = arith.constant 0 : i32
    %c0_i32_0 = arith.constant 0 : i32
    %c0_i32_1 = arith.constant 0 : i32
    return %c0_i32, %arg0, %c0_i32_0 : i32, i32, i32
  }
  func.func @transform_1(%arg0: i32) -> (i32, i32) {
    %c0_i32 = arith.constant 0 : i32
    %c0_i32_0 = arith.constant 0 : i32
    return %arg0, %c0_i32 : i32, i32
  }
  func.func @transform_2(%arg0: i32) -> (i32, i32) {
    %c0_i32 = arith.constant 0 : i32
    %c0_i32_0 = arith.constant 0 : i32
    %c0_i32_1 = arith.constant 0 : i32
    return %c0_i32, %c0_i32_0 : i32, i32
  }
  func.func @transform_3(%arg0: i32) -> (i32, i32) {
    %c0_i32 = arith.constant 0 : i32
    %c0_i32_0 = arith.constant 0 : i32
    %c0_i32_1 = arith.constant 0 : i32
    return %c0_i32, %c0_i32_0 : i32, i32
  }
  func.func @transform_4(%arg0: i32) -> (i32, i32) {
    %c0_i32 = arith.constant 0 : i32
    %c0_i32_0 = arith.constant 0 : i32
    %c0_i32_1 = arith.constant 0 : i32
    return %c0_i32, %c0_i32_0 : i32, i32
  }
  func.func @transform_5(%arg0: i32) -> (i32, i32) {
    %c0_i32 = arith.constant 0 : i32
    %c0_i32_0 = arith.constant 0 : i32
    %c0_i32_1 = arith.constant 0 : i32
    return %c0_i32, %c0_i32_0 : i32, i32
  }
  func.func @transform_6(%arg0: i32) -> (i32, i32) {
    %c0_i32 = arith.constant 0 : i32
    %c0_i32_0 = arith.constant 0 : i32
    return %arg0, %c0_i32 : i32, i32
  }
}

</mosaic_0001>

<bundles_post_ra>
// kernel: tpu_custom_call.1
= control target key start
LH: loop header
LB: loop body
LE: loop exit
PB: predicated region body
PF: predicated region fallthrough
CT: control target
= control target key end

     0   :  { %11 = vsyncpa [#allocation3], 0  ;;  %s731_s0 = inlined_call_operand.hbm [shape: f32[8,2,32], index: 0, kind: input, shape index: {}]   ;;  %s732_s1 = inlined_call_operand.hbm [shape: f32[2,32], index: 1, kind: input, shape index: {}]   ;;  %s733_s2 = inlined_call_operand.hbm [shape: f32[32,32], index: 2, kind: input, shape index: {}]   ;;  %s734_s3 = inlined_call_operand.hbm [shape: f32[32,32], index: 3, kind: input, shape index: {}]   ;;  %s735_s4 = inlined_call_operand.vmem [shape: f32[1,32], index: 4, kind: input, shape index: {}]   ;;  %s736_s5 = inlined_call_operand.vmem [shape: f32[1,32], index: 5, kind: input, shape index: {}]   ;;  %s737_s6 = inlined_call_operand.hbm [shape: f32[2,8], index: 6, kind: output, shape index: {}]  }
   0x1   :  { %12 = vsyncpa [#allocation6], 0 }
   0x2   :  { %13 = vsyncpa [#allocation9], 0  ;;  %s33_s23 = sshll.u32 %s732_s1, 4  ;;  %s34_s23 = int_to_ptr.hbm [resolvable:$true] %s33_s23 }
   0x3   :  { %14 = vsyncpa [#allocation4], 0  ;;  %s646_s24 = smov [#allocation5]   ;;  %s19_s28 = sshll.u32 %s731_s0, 4  ;;  %s20_s28 = int_to_ptr.hbm [resolvable:$true] %s19_s28 }
   0x4   :  { %s35_s25 = sshll.u32 %s646_s24, 4  ;;  %s647_s29 = smov [#allocation2]   ;;  %s36_s25 = int_to_ptr.vmem [resolvable:$true] %s35_s25 }
   0x5   :  { %38 = dma.hbm_to_vmem [thread:$0]  %s34_s23, 32, %s36_s25, [#allocation6]  }
   0x6   :  { %s21_s30 = sshll.u32 %s647_s29, 4  ;;  %s648_s7 = smov 32   ;;  %s22_s30 = int_to_ptr.vmem [resolvable:$true] %s21_s30 }
   0x7   :  { %s649_s8 = smov 2   ;;  %s43_s1 = sshll.u32 %s733_s2, 4  ;;  %s44_s1 = int_to_ptr.hbm [resolvable:$true] %s43_s1 }
   0x8   :  { %27 = dma.hbm_to_vmem [thread:$0]  %s20_s28, 256, %s22_s30, [#allocation3], %s648_s7, %s648_s7, %s649_s8  }
   0x9   :  { %s650_s11 = smov [#allocation7]   ;;  %s56_s0 = sshll.u32 %s734_s3, 4  ;;  %s57_s0 = int_to_ptr.hbm [resolvable:$true] %s56_s0 }
   0xa   :  { %s45_s12 = sshll.u32 %s650_s11, 4  ;;  %s651_s15 = smov 128   ;;  %s46_s12 = int_to_ptr.vmem [resolvable:$true] %s45_s12 }
   0xb   :  { %s652_s16 = smov 8   ;;  %s653_s17 = smov [#allocation8]  }
   0xc   :  { %51 = dma.hbm_to_vmem [thread:$0]  %s44_s1, 512, %s46_s12, [#allocation6], %s651_s15, %s651_s15, %s652_s16  }
   0xd   :  { %s58_s18 = sshll.u32 %s653_s17, 4  ;;  %s59_s18 = int_to_ptr.vmem [resolvable:$true] %s58_s18 }
   0xe   :  { %64 = dma.hbm_to_vmem [thread:$0]  %s57_s0, 512, %s59_s18, [#allocation9], %s651_s15, %s651_s15, %s652_s16  }
   0xf   :  { %638 = dma.done.wait [#allocation3], 256  }
  0x10   :  { %639 = vsyncadd [#allocation3], 4294967040 }
  0x11   :  { %640 = dma.done.wait [#allocation6], 544  }
  0x12   :  { %641 = vsyncadd [#allocation6], 4294966752 }
  0x13   :  { %642 = dma.done.wait [#allocation9], 512  }
  0x14   :  { %643 = vsyncadd [#allocation9], 4294966784  ;;  %v101_v0 = vld [vmem:[#allocation8 + $0x18] sm:$0xff]  ;;  %v100_v2 = vld [vmem:[#allocation8 + $0x10] sm:$0xff]  ;;  %vm102_vm0 = vcmask 261120   ;;  %vm342_vm1 = vcmask 254976  }
  0x15   :  { %v88_v1 = vld [vmem:[#allocation7 + $0x18] sm:$0xff]  ;;  %118 = vmatpush.msra.mxu0 %v101_v0  ;;  %v87_v3 = vld [vmem:[#allocation7 + $0x10] sm:$0xff]  ;;  %v99_v4 = vld [vmem:[#allocation8 + $0x8] sm:$0xff]  ;;  %vm385_vm2 = vcmask 1041409   ;;  %vm387_vm3 = vcmask 1042434   ;;  %vm389_vm4 = vcmask 1043459  }
  0x16   :  { %141 = vmatpush.msra.mxu1 %v88_v1  ;;  %164 = vmatpush.msra.mxu2 %v88_v1  ;;  %v86_v5 = vld [vmem:[#allocation7 + $0x8] sm:$0xff]  ;;  %v98_v6 = vld [vmem:[#allocation8] sm:$0xff]  ;;  %v97_v8 = vld [vmem:[#allocation5] sm:$0x3]  ;;  %vm391_vm5 = vcmask 1044484   ;;  %vm393_vm6 = vcmask 1045509  }
  0x17   :  { %187 = vmatpush.msra.mxu3 %v88_v1  ;;  %119 = vmatpush.msra.mxu0 %v100_v2  ;;  %v85_v7 = vld [vmem:[#allocation7] sm:$0xff]  ;;  %v89_v9 = vld [vmem:[#allocation2] sm:$0x3]  ;;  %v90_v10 = vld [vmem:[#allocation2 + $0x2] sm:$0x3]  ;;  %vm395_vm7 = vcmask 1046534  }
  0x18   :  { %142 = vmatpush.msra.mxu1 %v87_v3  ;;  %165 = vmatpush.msra.mxu2 %v87_v3  ;;  %v91_v11 = vld [vmem:[#allocation2 + $0x4] sm:$0x3]  ;;  %v92_v12 = vld [vmem:[#allocation2 + $0x6] sm:$0x3]  ;;  %v93_v13 = vld [vmem:[#allocation2 + $0x8] sm:$0x3] }
  0x19   :  { %188 = vmatpush.msra.mxu3 %v87_v3  ;;  %120 = vmatpush.msra.mxu0 %v99_v4  ;;  %v94_v14 = vld [vmem:[#allocation2 + $0xa] sm:$0x3]  ;;  %v95_v15 = vld [vmem:[#allocation2 + $0xc] sm:$0x3]  ;;  %v96_v16 = vld [vmem:[#allocation2 + $0xe] sm:$0x3] }
  0x1a   :  { %143 = vmatpush.msra.mxu1 %v86_v5  ;;  %166 = vmatpush.msra.mxu2 %v86_v5  ;;  %v496_v17 = vld [vmem:[%s735_s4] ss:$0 sm:$0xff]  ;;  %vm397_vm8 = vcmask 1047559   ;;  %vm432_vm9 = vcmask 58368   ;;  %s654_s4 = smov [#allocation10]   ;;  %s465_s23 = sshll.u32 %s737_s6, 4  ;;  %s466_s23 = int_to_ptr.hbm [resolvable:$true] %s465_s23 }
  0x1b   :  { %189 = vmatpush.msra.mxu3 %v86_v5  ;;  %121 = vmatpush.msra.mxu0 %v98_v6  ;;  %v497_v26 = vld [vmem:[%s736_s5] ss:$0 sm:$0xff]  ;;  %s463_s5 = sshll.u32 %s654_s4, 4  ;;  %s464_s5 = int_to_ptr.vmem [resolvable:$true] %s463_s5 }
  0x1c   :  { %144 = vmatpush.msra.mxu1 %v85_v7  ;;  %167 = vmatpush.msra.mxu2 %v85_v7 }
  0x1d   :  { %190 = vmatpush.msra.mxu3 %v85_v7  ;;  %477 = vmatmul.msk.f32.vlgmr.msra.gmra.mxu0 %vm102_vm0, %v97_v8 }
  0x1e   :  { %478 = vmatmul.msk.f32.vlgmr.msra.gmra.mxu1 %vm102_vm0, %v89_v9  ;;  %479 = vmatmul.msk.f32.vlgmr.msra.gmra.mxu2 %vm102_vm0, %v90_v10 }
  0x1f   :  { %480 = vmatmul.msk.f32.vlgmr.msra.gmra.mxu3 %vm102_vm0, %v91_v11  ;;  %210 = vmatpush.msrb.mxu0 %v88_v1 }
  0x20   :  { %233 = vmatpush.msrb.mxu1 %v88_v1  ;;  %256 = vmatpush.msrb.mxu2 %v88_v1 }
  0x21   :  { %279 = vmatpush.msrb.mxu3 %v88_v1  ;;  %211 = vmatpush.msrb.mxu0 %v87_v3 }
  0x22   :  { %234 = vmatpush.msrb.mxu1 %v87_v3  ;;  %257 = vmatpush.msrb.mxu2 %v87_v3 }
  0x23   :  { %280 = vmatpush.msrb.mxu3 %v87_v3  ;;  %212 = vmatpush.msrb.mxu0 %v86_v5 }
  0x24   :  { %235 = vmatpush.msrb.mxu1 %v86_v5  ;;  %258 = vmatpush.msrb.mxu2 %v86_v5 }
  0x25   :  { %281 = vmatpush.msrb.mxu3 %v86_v5  ;;  %213 = vmatpush.msrb.mxu0 %v85_v7 }
  0x26   :  { %236 = vmatpush.msrb.mxu1 %v85_v7  ;;  %259 = vmatpush.msrb.mxu2 %v85_v7 }
  0x27   :  { %282 = vmatpush.msrb.mxu3 %v85_v7  ;;  %481 = vmatmul.msk.f32.vlgmr.msrb.gmra.mxu0 %vm102_vm0, %v92_v12 }
  0x28   :  { %482 = vmatmul.msk.f32.vlgmr.msrb.gmra.mxu1 %vm102_vm0, %v93_v13  ;;  %483 = vmatmul.msk.f32.vlgmr.msrb.gmra.mxu2 %vm102_vm0, %v94_v14 }
  0x29   :  { %484 = vmatmul.msk.f32.vlgmr.msrb.gmra.mxu3 %vm102_vm0, %v95_v15  ;;  %302 = vmatpush.msra.mxu0 %v88_v1 }
  0x2b   :  { %303 = vmatpush.msra.mxu0 %v87_v3 }
  0x2d   :  { %304 = vmatpush.msra.mxu0 %v86_v5  ;;  %v375_v5 = vlaneseq }
  0x2f   :  { %305 = vmatpush.msra.mxu0 %v85_v7  ;;  %v376_v8 = vand.u32 127, %v375_v5 }
  0x30   :  { %485 = vmatmul.msk.f32.vlgmr.msra.gmra.mxu0 %vm102_vm0, %v96_v16 }
  0x9a   :  { %v123_v18 = vpop.f32.mrf.mxu0 }
  0x9b   :  { %v146_v19 = vpop.f32.mrf.mxu1 }
  0x9c   :  { %v147_v20 = vadd.f32 %v146_v19, %v123_v18 }
  0x9e   :  { %v314_v21 = vadd.f32 %v496_v17, %v147_v20 }
  0xa0   :  { %498 = vtanh.f32 %v314_v21 }
  0xa1   :  { %v169_v22 = vpop.f32.mrf.mxu2 }
  0xa2   :  { %v192_v23 = vpop.f32.mrf.mxu3  ;;  %v170_v24 = vadd.f32 %v169_v22, %v123_v18 }
  0xa3   :  { %v193_v25 = vadd.f32 %v192_v23, %v123_v18 }
  0xa4   :  { %v315_v27 = vadd.f32 %v496_v17, %v170_v24  ;;  %v215_v29 = vpop.f32.mrf.mxu0 }
  0xa5   :  { %v316_v28 = vadd.f32 %v496_v17, %v193_v25  ;;  %v238_v30 = vpop.f32.mrf.mxu1  ;;  %v216_v32 = vadd.f32 %v215_v29, %v123_v18 }
  0xa6   :  { %v499_v31 = vpop.eup %498  ;;  %v239_v33 = vadd.f32 %v238_v30, %v123_v18  ;;  %500 = vtanh.f32 %v315_v27 }
  0xa7   :  { %v334_v34 = vmul.f32 %v499_v31, %v497_v26  ;;  %502 = vtanh.f32 %v316_v28  ;;  %v317_v35 = vadd.f32 %v496_v17, %v216_v32 }
  0xa8   :  { %v318_v36 = vadd.f32 %v496_v17, %v239_v33 }
  0xa9   :  { %v343_v37 = vsel %vm342_vm1, %v334_v34, 0.0 }
  0xaa   :  { %344 = vadd.xlane.f32.xlu0 %v343_v37  ;;  %504 = vtanh.f32 %v318_v36 }
  0xab   :  { %506 = vtanh.f32 %v317_v35  ;;  %v261_v38 = vpop.f32.mrf.mxu2 }
  0xac   :  { %v284_v39 = vpop.f32.mrf.mxu3  ;;  %v501_v40 = vpop.eup %500  ;;  %v262_v41 = vadd.f32 %v261_v38, %v123_v18 }
  0xad   :  { %v285_v42 = vadd.f32 %v284_v39, %v123_v18  ;;  %v503_v43 = vpop.eup %502  ;;  %v307_v44 = vpop.f32.mrf.mxu0  ;;  %v335_v45 = vmul.f32 %v501_v40, %v497_v26 }
  0xae   :  { %v319_v46 = vadd.f32 %v496_v17, %v262_v41  ;;  %v308_v48 = vadd.f32 %v307_v44, %v123_v18  ;;  %v336_v49 = vmul.f32 %v503_v43, %v497_v26 }
  0xaf   :  { %v320_v47 = vadd.f32 %v496_v17, %v285_v42  ;;  %v346_v53 = vsel %vm342_vm1, %v335_v45, 0.0 }
  0xb0   :  { %v505_v50 = vpop.eup %504  ;;  %508 = vtanh.f32 %v319_v46  ;;  %v321_v51 = vadd.f32 %v496_v17, %v308_v48  ;;  %v349_v52 = vsel %vm342_vm1, %v336_v49, 0.0 }
  0xb1   :  { %v507_v54 = vpop.eup %506  ;;  %510 = vtanh.f32 %v320_v47  ;;  %350 = vadd.xlane.f32.xlu1 %v349_v52  ;;  %v338_v55 = vmul.f32 %v505_v50, %v497_v26 }
  0xb2   :  { %347 = vadd.xlane.f32.xlu0 %v346_v53  ;;  %512 = vtanh.f32 %v321_v51  ;;  %v337_v57 = vmul.f32 %v507_v54, %v497_v26 }
  0xb3   :  { %v355_v56 = vsel %vm342_vm1, %v338_v55, 0.0 }
  0xb4   :  { %356 = vadd.xlane.f32.xlu2 %v355_v56  ;;  %v352_v61 = vsel %vm342_vm1, %v337_v57, 0.0 }
  0xb6   :  { %v509_v58 = vpop.eup %508 }
  0xb7   :  { %v511_v59 = vpop.eup %510  ;;  %v339_v60 = vmul.f32 %v509_v58, %v497_v26 }
  0xb8   :  { %v340_v62 = vmul.f32 %v511_v59, %v497_v26  ;;  %v513_v63 = vpop.eup %512 }
  0xb9   :  { %353 = vadd.xlane.f32.xlu1 %v352_v61  ;;  %v358_v1 = vsel %vm342_vm1, %v339_v60, 0.0  ;;  %v341_v2 = vmul.f32 %v513_v63, %v497_v26 }
  0xba   :  { %v361_v0 = vsel %vm342_vm1, %v340_v62, 0.0 }
  0xbb   :  { %362 = vadd.xlane.f32.xlu0 %v361_v0  ;;  %v364_v3 = vsel %vm342_vm1, %v341_v2, 0.0 }
  0xbc   :  { %359 = vadd.xlane.f32.xlu2 %v358_v1 }
  0xc1   :  { %365 = vadd.xlane.f32.xlu1 %v364_v3 }
 0x11d   :  { %v345_v4 = vpop.xlane.xlu0 %344 }
 0x11e   :  { %v377_v11 = vperm.slane %v345_v4, %v376_v8 }
 0x124   :  { %v351_v6 = vpop.xlane.xlu1 %350 }
 0x125   :  { %v348_v7 = vpop.xlane.xlu0 %347  ;;  %v379_v13 = vperm.slane %v351_v6, %v376_v8 }
 0x126   :  { %v378_v10 = vperm.slane %v348_v7, %v376_v8 }
 0x127   :  { %v357_v9 = vpop.xlane.xlu2 %356 }
 0x128   :  { %v386_v12 = vsel %vm385_vm2, %v378_v10, %v377_v11  ;;  %v381_v16 = vperm.slane %v357_v9, %v376_v8 }
 0x129   :  { %v388_v17 = vsel %vm387_vm3, %v379_v13, %v386_v12 }
 0x12c   :  { %v354_v14 = vpop.xlane.xlu1 %353 }
 0x12d   :  { %v380_v15 = vperm.slane %v354_v14, %v376_v8 }
 0x12e   :  { %v363_v20 = vpop.xlane.xlu0 %362 }
 0x12f   :  { %v390_v18 = vsel %vm389_vm4, %v380_v15, %v388_v17  ;;  %v360_v19 = vpop.xlane.xlu2 %359  ;;  %v383_v23 = vperm.slane %v363_v20, %v376_v8 }
 0x130   :  { %v382_v21 = vperm.slane %v360_v19, %v376_v8  ;;  %v392_v22 = vsel %vm391_vm5, %v381_v16, %v390_v18 }
 0x132   :  { %v394_v24 = vsel %vm393_vm6, %v382_v21, %v392_v22 }
 0x133   :  { %v396_v27 = vsel %vm395_vm7, %v383_v23, %v394_v24 }
 0x134   :  { %v366_v25 = vpop.xlane.xlu1 %365 }
 0x135   :  { %v384_v26 = vperm.slane %v366_v25, %v376_v8 }
 0x137   :  { %v398_v28 = vsel %vm397_vm8, %v384_v26, %v396_v27 }
 0x138   :  { %400 = vxpose.xlu2.b32.start.end [1/1] (short) (narrow) %v398_v28, 8 }
 0x1d1   :  { %v416_v29 = vpop.trf.xlu2 }
 0x1d2   :  { %v433_v30 = vsel %vm432_vm9, %v416_v29, -inf }
 0x1d3   :  { %434 = vmax.xlane.f32.xlu0 %v433_v30 }
 0x246   :  { %v435_v31 = vpop.xlane.xlu0 %434 }
 0x247   :  { %v436_v32 = vsub.f32 %v416_v29, %v435_v31 }
 0x249   :  { %v437_v33 = vmul.f32 1.442695, %v436_v32 }
 0x24b   :  { %514 = vpow2.f32 %v437_v33 }
 0x251   :  { %v515_v34 = vpop.eup %514 }
 0x252   :  { %v439_v35 = vsel %vm432_vm9, %v515_v34, 0.0 }
 0x253   :  { %440 = vadd.xlane.f32.xlu1 %v439_v35 }
 0x2c6   :  { %v441_v36 = vpop.xlane.xlu1 %440 }
 0x2c7   :  { %516 = vrcp.f32 %v441_v36  ;;  %v453_v40 = vand.u32 2147483648, %v441_v36  ;;  %v451_v42 = vand.u32 2147483647, %v441_v36  ;;  %vm447_vm11 = vweird.f32 %v441_v36 }
 0x2c9   :  { %v454_v44 = vor.u32 1.1754944e-38, %v453_v40  ;;  %vm452_vm13 = vcmp.eq.f32.partialorder %v451_v42, 8.507059e+37 }
 0x2cd   :  { %v517_v37 = vpop.eup %516 }
 0x2ce   :  { %v443_v38 = vmul.f32 %v517_v37, %v441_v36  ;;  %vm448_vm10 = vweird.f32 %v517_v37 }
 0x2cf   :  { %vm449_vm12 = vmor %vm447_vm11, %vm448_vm10 }
 0x2d0   :  { %v444_v39 = vsub.f32 1.0, %v443_v38 }
 0x2d2   :  { %v445_v41 = vmul.f32 %v517_v37, %v444_v39 }
 0x2d4   :  { %v446_v43 = vadd.f32 %v517_v37, %v445_v41 }
 0x2d6   :  { %v450_v45 = vsel %vm449_vm12, %v517_v37, %v446_v43 }
 0x2d7   :  { %v455_v46 = vsel %vm452_vm13, %v454_v44, %v450_v45 }
 0x2d8   :  { %v456_v47 = vmul.f32 %v515_v34, %v455_v46 }
 0x2da   :  { %457 = vst.msk [vmem:[#allocation10] sm:$0x3] %vm432_vm9, %v456_v47 }
 0x2db   :  { %468 = dma.vmem_to_hbm [thread:$0]  %s464_s5, 32, %s466_s23, [#allocation4]  }
 0x2dc   :  { %644 = dma.done.wait [#allocation4], 32  }
 0x2dd   :  { %645 = vsyncadd [#allocation4], 4294967264 }
 0x2de   :  { %473 = vsyncpa [#allocation3], 1 }
 0x2df   :  { %474 = vsyncpa [#allocation6], 1 }
 0x2e0   :  { %475 = vsyncpa [#allocation9], 1 }
 0x2e1   :  { %476 = vsyncpa [#allocation4], 1 }

</bundles_post_ra>
